<compile_context>
chip_gen: v7x
topology: tpu7x:2x2x1
jax: 0.10.0
libtpu: 0.0.40
codegen_flags: <defaults>
</compile_context>

<pallas_src>
import math
import jax
import jax.numpy as jnp
from jax.experimental import pallas as pl
from jax.experimental.pallas import tpu as pltpu


# ----------------------------------------------------------------------------
# Parameter setup (matches torch __init__ exactly)
# ----------------------------------------------------------------------------
def make_positional_encoding(max_len: int, hidden_dim: int, dtype=jnp.float32):
    position = jnp.arange(max_len, dtype=jnp.float32)[:, None]            # (L, 1)
    div_term = jnp.exp(
        jnp.arange(0, hidden_dim, 2, dtype=jnp.float32)
        * (-math.log(10000.0) / hidden_dim)
    )                                                                      # (H/2,)
    angles = position * div_term                                           # (L, H/2)
    pe = jnp.zeros((max_len, hidden_dim), dtype=jnp.float32)
    pe = pe.at[:, 0::2].set(jnp.sin(angles))
    pe = pe.at[:, 1::2].set(jnp.cos(angles))
    # unsqueeze(0).transpose(0,1)  ->  (max_len, 1, hidden_dim)
    return pe[:, None, :].astype(dtype)


# ----------------------------------------------------------------------------
# Kernels (pure elementwise, mem-bound)
# ----------------------------------------------------------------------------
def _pe_add_kernel(x_ref, pe_ref, o_ref):
    # x_ref: (1, ts, H), pe_ref: (1, ts, H)
    o_ref[...] = x_ref[...] + pe_ref[...]


def _pe_add_dropout_kernel(x_ref, pe_ref, mask_ref, o_ref):
    # mask is already scaled: mask in {0, 1/(1-p)}
    o_ref[...] = (x_ref[...] + pe_ref[...]) * mask_ref[...]


def _choose_seq_tile(S, H, itemsize, n_streams, vmem_budget_bytes):
    """Largest seq tile (multiple of 8, <=1024) whose double-buffered streams fit budget."""
    per_row = n_streams * 2 * max(H, 1) * itemsize     # 2x = double-buffering
    ts = max(8, vmem_budget_bytes // per_row)
    ts = min(int(ts), 1024)
    ts -= ts % 8
    ts = max(ts, 8)
    if S <= ts:
        return S                                       # full-extent block is always legal
    return ts


# ----------------------------------------------------------------------------
# Wrapper: y = dropout(x + pe[:S])
# ----------------------------------------------------------------------------
def positional_encoding_forward(x, pe, *, p=0.1, training=True, key=None):
    """x: (S, B, H), pe: (max_len, 1, H).  Returns (S, B, H) in x.dtype."""
    S, B, H = x.shape
    dtype = x.dtype
    apply_dropout = bool(training) and float(p) > 0.0

    # Lane/sublane-dense layout: (B, S, H) -> seq tile on sublanes, H on lanes.
    xt = jnp.transpose(x, (1, 0, 2))                       # (B, S, H)
    pe_t = jnp.transpose(pe[:S].astype(dtype), (1, 0, 2))  # (1, S, H)

    n_streams = 4 if apply_dropout else 3                  # x, pe, (mask), out
    ts = _choose_seq_tile(S, H, jnp.dtype(dtype).itemsize, n_streams,
                          vmem_budget_bytes=24 * 1024 * 1024)
    grid = (B, pl.cdiv(S, ts))

    in_specs = [
        pl.BlockSpec((1, ts, H), lambda b, i: (b, i, 0)),   # x block
        pl.BlockSpec((1, ts, H), lambda b, i: (0, i, 0)),   # pe block (broadcast over batch)
    ]
    args = [xt, pe_t]
    kernel = _pe_add_kernel

    if apply_dropout:
        if key is None:
            key = jax.random.PRNGKey(0)
        # TODO(synk): dropout mask uses jax.random in the wrapper (not bit-identical to
        # PyTorch's RNG stream); in-kernel TPU hardware PRNG is avoided so the kernel
        # also lowers cleanly under interpret mode.
        keep = jax.random.bernoulli(key, 1.0 - p, (B, S, H))
        mask = keep.astype(dtype) * jnp.asarray(1.0 / (1.0 - p), dtype)
        in_specs.append(pl.BlockSpec((1, ts, H), lambda b, i: (b, i, 0)))
        args.append(mask)
        kernel = _pe_add_dropout_kernel

    out_t = pl.pallas_call(
        kernel,
        out_shape=jax.ShapeDtypeStruct((B, S, H), dtype),
        grid=grid,
        in_specs=in_specs,
        out_specs=pl.BlockSpec((1, ts, H), lambda b, i: (b, i, 0)),
        compiler_params=pltpu.CompilerParams(
            # All tiles are independent -> let v7x megacore shard both grid axes.
            dimension_semantics=("parallel", "parallel"),
            vmem_limit_bytes=48 * 1024 * 1024,
        ),
    )(*args)

    return jnp.transpose(out_t, (1, 0, 2))                 # back to (S, B, H)


# ----------------------------------------------------------------------------
# Demo / self-check
# ----------------------------------------------------------------------------
if __name__ == "__main__":
    SEQ, BATCH, HIDDEN, MAX_LEN = 16, 2, 32, 256
    DROPOUT_P = 0.1

    key = jax.random.PRNGKey(0)
    kx, kd = jax.random.split(key)
    x = jax.random.normal(kx, (SEQ, BATCH, HIDDEN), dtype=jnp.float32)
    pe = make_positional_encoding(MAX_LEN, HIDDEN, dtype=jnp.float32)

    ref = x + pe[:SEQ]  # broadcast (S,1,H) over batch, like torch

    # Eval mode (dropout = identity): exact check against the reference.
    y_eval = positional_encoding_forward(x, pe, p=DROPOUT_P, training=False)
    y_eval = jax.block_until_ready(y_eval)
    assert y_eval.shape == x.shape and y_eval.dtype == x.dtype
    assert jnp.allclose(y_eval, ref, atol=1e-6, rtol=1e-6)

    # Training mode (inverted dropout): every output is either 0 or (x+pe)/(1-p).
    y_train = positional_encoding_forward(x, pe, p=DROPOUT_P, training=True, key=kd)
    y_train = jax.block_until_ready(y_train)
    assert y_train.shape == x.shape
    scaled = ref / (1.0 - DROPOUT_P)
    ok = jnp.isclose(y_train, 0.0, atol=1e-6) | jnp.isclose(y_train, scaled, atol=1e-5)
    assert bool(jnp.all(ok))

    print("KERNEL_OK")
</pallas_src>

<mosaic_0001>
module attributes {stable_mosaic.version = 11 : i64} {
  func.func @_pe_add_kernel(%arg0: i32, %arg1: i32, %arg2: memref<1x16x32xf32, #tpu.memory_space<vmem>>, %arg3: memref<1x16x32xf32, #tpu.memory_space<vmem>>, %arg4: memref<1x16x32xf32, #tpu.memory_space<vmem>>) attributes {dimension_semantics = [#tpu.dimension_semantics<parallel>, #tpu.dimension_semantics<parallel>], iteration_bounds = array<i64: 2, 1>, scalar_prefetch = 0 : i64, scratch_operands = 0 : i64, tpu.core_type = #tpu.core_type<tc>, window_params = [{transform_indices = @transform_0, window_bounds = array<i64: 1, 16, 32>}, {transform_indices = @transform_1, window_bounds = array<i64: 1, 16, 32>}, {transform_indices = @transform_2, window_bounds = array<i64: 1, 16, 32>}]} {
    %c0 = arith.constant 0 : index
    %c0_0 = arith.constant 0 : index
    %c0_1 = arith.constant 0 : index
    %0 = vector.load %arg2[%c0, %c0_0, %c0_1] : memref<1x16x32xf32, #tpu.memory_space<vmem>>, vector<1x16x32xf32>
    %c0_2 = arith.constant 0 : index
    %c0_3 = arith.constant 0 : index
    %c0_4 = arith.constant 0 : index
    %1 = vector.load %arg3[%c0_2, %c0_3, %c0_4] : memref<1x16x32xf32, #tpu.memory_space<vmem>>, vector<1x16x32xf32>
    %2 = arith.addf %0, %1 : vector<1x16x32xf32>
    %c0_5 = arith.constant 0 : index
    %c0_6 = arith.constant 0 : index
    %c0_7 = arith.constant 0 : index
    %3 = vector.load %arg4[%c0_5, %c0_6, %c0_7] : memref<1x16x32xf32, #tpu.memory_space<vmem>>, vector<1x16x32xf32>
    tpu.vector_store %arg4[%c0_5, %c0_6, %c0_7], %2 {strides = array<i32>} : memref<1x16x32xf32, #tpu.memory_space<vmem>>, vector<1x16x32xf32>,
    return
  }
  func.func @transform_0(%arg0: i32, %arg1: i32) -> (i32, i32, i32) {
    %c0_i32 = arith.constant 0 : i32
    %c0_i32_0 = arith.constant 0 : i32
    return %arg0, %arg1, %c0_i32 : i32, i32, i32
  }
  func.func @transform_1(%arg0: i32, %arg1: i32) -> (i32, i32, i32) {
    %c0_i32 = arith.constant 0 : i32
    %c0_i32_0 = arith.constant 0 : i32
    %c0_i32_1 = arith.constant 0 : i32
    return %c0_i32, %arg1, %c0_i32_0 : i32, i32, i32
  }
  func.func @transform_2(%arg0: i32, %arg1: i32) -> (i32, i32, i32) {
    %c0_i32 = arith.constant 0 : i32
    %c0_i32_0 = arith.constant 0 : i32
    return %arg0, %arg1, %c0_i32 : i32, i32, i32
  }
}

</mosaic_0001>

<bundles_post_ra>
// kernel: tpu_custom_call.1
= control target key start
LH: loop header
LB: loop body
LE: loop exit
PB: predicated region body
PF: predicated region fallthrough
CT: control target
= control target key end

     0   :  { %7 = vsyncpa [#allocation3], 0  ;;  %s819_s0 = inlined_call_operand.hbm [shape: f32[2,16,32], index: 0, kind: input, shape index: {}]   ;;  %s820_s1 = inlined_call_operand.hbm [shape: f32[1,16,32], index: 1, kind: input, shape index: {}]   ;;  %s821_s2 = inlined_call_operand.hbm [shape: f32[2,16,32], index: 2, kind: output, shape index: {}]  }
   0x1   :  { %9 = vsyncpa [#allocation3 + $0x1], 0 }
   0x2   :  { %10 = vsyncpa [#allocation6], 0 }
   0x3   :  { %11 = vsyncpa [#allocation4], 0 }
   0x4   :  { %13 = vsyncpa [#allocation4 + $0x1], 0  ;;  %s594_s9 = smov 0   ;;  %s596_s10 = smov 0  }
   0x5   :  { %s598_s11 = smov 0   ;;  %s600_s12 = smov 0  }
   0x6   :  { %s602_s13 = smov 0   ;;  %s604_s14 = smov 0  }
   0x7 LB: > { %s330_s15 = sadd.s32 4294967295, %s570_s14   ;;  %s331_s16 = sadd.s32 4294967294, %s570_s14   ;;  %s570_s14 = sphi %s604_s14, %s19_s14   ;;  %s566_s13 = sphi %s602_s13, %s845_s13   ;;  %s562_s12 = sphi %s600_s12, %s844_s12   ;;  %s558_s11 = sphi %s598_s11, %s843_s11   ;;  %s554_s10 = sphi %s596_s10, %s842_s10   ;;  %s550_s9 = sphi %s594_s9, %s841_s9  }
   0x8   : > { %p53_p0 = scmp.ne.s32.totalorder %s554_s10, %s550_s9  ;;  %p628_p1 = scmp.eq.s32.totalorder %s330_s15, 0 }
   0x9   : > { %p632_p2 = scmp.eq.s32.totalorder %s330_s15, 1  ;;  %p111_p3 = scmp.eq.s32.totalorder %s331_s16, 1 }
   0xa   : > { %s826_s17 = scalar_select %p628_p1, 1, 0 }
   0xb   : > { %s827_s18 = scalar_select %p632_p2, 1, 0 }
   0xc   : > { %p638_p4 = por %p628_p1, %p53_p0  ;;  %p332_p5 = scmp.ge.s32.totalorder %s570_s14, 1 }
   0xd   : > { %p643_p6 = por %p111_p3, %p53_p0  ;;  %p118_p7 = scmp.lt.s32.totalorder %s570_s14, 3 }
   0xe   : > { %s828_s19 = scalar_select %p638_p4, 1, 0 }
   0xf   : > { %s829_s20 = scalar_select %p643_p6, 1, 0 }
  0x10   : > { %p648_p8 = pnand %p332_p5, %p118_p7  ;;  %s572_s22 = smov [#allocation5]  }
  0x11   : > { %s133_s23 = sshll.u32 %s572_s22, 4  ;;  %s31_s25 = sadd.s32 1, %s566_s13  ;;  %s134_s23 = int_to_ptr.vmem [resolvable:$true] %s133_s23 }
  0x12   : > { %s830_s21 = scalar_select %p648_p8, 1, 0 }
  0x13   : > { %p357_p9 = pneg %p648_p8  ;;  %s426_s28 = scalar_lea.hbm %s820_s1, 256 }
  0x14   : > { %p427_p12 = scmp.ne.s32.totalorder %s820_s1, %s426_s28  ;;  %p433_p5 = scmp.lt.u32.totalorder %s426_s28, %s820_s1 }
  0x15   : > { %p657_p11 = pnand %p357_p9, %p628_p1 }
  0x17   : > { %p428_p13 = pneg %p657_p11 }
  0x19   : > { %p429_p0 = pnand %p428_p13, %p427_p12 }
  0x1b   : > { %p430_p3 = pneg %p429_p0 }
  0x1d   : > { %p435_p7 = pnand %p433_p5, %p430_p3 }
  0x1f   : > { %438 = shalt.err (!%p435_p7)
}
  0x20   : > { %s439_s5 = scalar_lea.vmem %s134_s23, 256  ;;  %p447_p1 = scmp.lt.s32.totalorder %s134_s23, %s134_s23 }
  0x21   : > { %p440_p9 = scmp.ne.s32.totalorder %s134_s23, %s439_s5  ;;  %p448_p4 = scmp.lt.s32.totalorder %s439_s5, %s439_s5 }
  0x23   : > { %p442_p10 = pnand %p440_p9, %p428_p13  ;;  %p449_p8 = por %p448_p4, %p447_p1 }
  0x25   : > { %p443_p6 = pneg %p442_p10 }
  0x27   : > { %p450_p2 = pnand %p449_p8, %p443_p6 }
  0x29   : > { %453 = shalt.err (!%p450_p2)
}
  0x2a   : > { %s573_s6 = smov 128   ;;  %s574_s7 = smov 8  }
  0x2b   : > { %360 = dma.hbm_to_vmem [thread:$0]  (!%p657_p11), %s820_s1, 256, %s134_s23, [#allocation6], %s573_s6, %s573_s6, %s574_s7  }
  0x2c   : > { %p33_p1 = scmp.ge.s32.totalorder %s31_s25, 2  ;;  %s40_s16 = sadd.s32 1, %s558_s11 }
  0x2d   : > { %p47_p2 = scmp.ne.s32.totalorder %s558_s11, %s554_s10  ;;  %p48_p4 = scmp.eq.s32.totalorder %s570_s14, 0 }
  0x2e   : > { %s847_s25 = smov (%p33_p1, %s31_s25), 0  ;;  %p833_p8 = scmp.ne.s32.totalorder %s827_s18, 0 }
  0x2f   : > { %p687_p6 = por %p48_p4, %p47_p2  ;;  %s35_s26 = ssub.s32 %s566_s13, %s847_s25 }
  0x30   : > { %p693_p10 = por %p833_p8, %p47_p2  ;;  %p370_p12 = scmp.lt.s32.totalorder %s570_s14, 2 }
  0x31   : > { %p38_p11 = scmp.eq.s32.totalorder %s35_s26, 0  ;;  %s147_s23 = sand.u32 1, %s558_s11  }
  0x32   : > { %s335_s27 = sshll.u32 %s147_s23, 4  ;;  %s347_s29 = sshll.u32 %s566_s13, 8 }
  0x33   : > { %s702_s28 = scalar_select %p38_p11, %s558_s11, %s40_s16  }
  0x34   : > { %s708_s4 = scalar_lea.hbm %s819_s0, %s347_s29  ;;  %s151_s18 = scalar_lea.vmem [#allocation2], %s335_s27 }
  0x35   : > { %s160_s5 = sshll.u32 %s151_s18, 4  ;;  %p714_p13 = pnand %p370_p12, %p687_p6  ;;  %s710_s5 = int_to_ptr.vmem [resolvable:$true] %s160_s5 }
  0x36   : > { %s718_s15 = scalar_lea.sflag [#allocation3], %s147_s23  ;;  %s454_s16 = scalar_lea.hbm %s708_s4, 256 }
  0x37   : > { %p455_p0 = scmp.ne.s32.totalorder %s708_s4, %s454_s16  ;;  %p456_p3 = pneg %p714_p13 }
  0x38   : > { %s459_s22 = scalar_lea.hbm %s819_s0, 512  ;;  %p460_p9 = scmp.lt.u32.totalorder %s708_s4, %s819_s0 }
  0x39   : > { %p457_p5 = pnand %p456_p3, %p455_p0  ;;  %p461_p1 = scmp.lt.u32.totalorder %s459_s22, %s454_s16 }
  0x3a   : > { %p463_p4 = scmp.lt.u32.totalorder %s454_s16, %s708_s4 }
  0x3b   : > { %p458_p7 = pneg %p457_p5  ;;  %p462_p2 = por %p461_p1, %p460_p9 }
  0x3d   : > { %p464_p6 = por %p463_p4, %p462_p2 }
  0x3f   : > { %p465_p8 = pnand %p464_p6, %p458_p7 }
  0x41   : > { %468 = shalt.err (!%p465_p8)
}
  0x42   : > { %s469_s23 = scalar_lea.vmem %s710_s5, 256  ;;  %s575_s3 = smov [#allocation2]  }
  0x43   : > { %p470_p12 = scmp.ne.s32.totalorder %s710_s5, %s469_s23  ;;  %s474_s18 = sshll.u32 %s575_s3, 4  ;;  %s475_s18 = int_to_ptr.vmem [resolvable:$false] %s474_s18 }
  0x44   : > { %s476_s26 = scalar_lea.vmem %s475_s18, 512  ;;  %p477_p5 = scmp.lt.s32.totalorder %s710_s5, %s475_s18 }
  0x45   : > { %p472_p11 = pnand %p470_p12, %p456_p3  ;;  %p478_p9 = scmp.lt.s32.totalorder %s476_s26, %s469_s23 }
  0x47   : > { %p473_p0 = pneg %p472_p11  ;;  %p479_p1 = por %p478_p9, %p477_p5 }
  0x49   : > { %p480_p2 = pnand %p479_p1, %p473_p0 }
  0x4b   : > { %483 = shalt.err (!%p480_p2)
}
  0x4c   : > { %364 = dma.hbm_to_vmem [thread:$0]  (!%p714_p13), %s708_s4, 256, %s710_s5, %s718_s15, %s573_s6, %s573_s6, %s574_s7  }
  0x4d   : > { %p836_p3 = scmp.ne.s32.totalorder %s830_s21, 0 }
  0x4e   : > { %s752_s16 = sand.u32 (!%p836_p3), 1, %s554_s10   ;;  %p837_p7 = scmp.ne.s32.totalorder (!%p836_p3), %s828_s19, 0 }
  0x4f   : > { %172 = sbr.rel (%p836_p3) target bundleno = 116 (0x74), region = 28  ;;  %s339_s27 = sshll.u32 (!%p836_p3), %s752_s16, 4 }
  0x50   : > { %s175_s22 = scalar_lea.sflag (!%p836_p3), [#allocation3], %s752_s16  ;;  %s178_s29 = scalar_lea.vmem (!%p836_p3), [#allocation2], %s339_s27 }
  0x56   : > { %537 = dma.done.wait (%p837_p7), %s175_s22, 256  }
  0x57   : > { %539 = vsyncadd (%p837_p7), %s175_s22, 4294967040  ;;  %p838_p4 = scmp.ne.s32.totalorder %s826_s17, 0 }
  0x59   : > { %541 = dma.done.wait (%p838_p4), [#allocation6], 256  }
  0x5a   : > { %543 = vsyncadd (%p838_p4), [#allocation6], 4294967040  ;;  %s202_s21 = scalar_lea.vmem [#allocation7], %s339_s27  ;;  %s348_s7 = sshll.u32 %s562_s12, 8  ;;  %v206_v0 = vld [vmem:[%s178_s29] sm:$0xff]  ;;  %vm212_vm0 = vcmask 261120  }
  0x5b   : > { %s231_s6 = sshll.u32 %s202_s21, 4  ;;  %v208_v1 = vld [vmem:[#allocation5] sm:$0xff]  ;;  %v207_v2 = vld [vmem:[%s178_s29 + $0x8] sm:$0xff]  ;;  %s770_s4 = scalar_lea.hbm %s821_s2, %s348_s7  ;;  %s765_s6 = int_to_ptr.vmem [resolvable:$true] %s231_s6 }
  0x5c   : > { %v210_v3 = vadd.f32 %v208_v1, %v206_v0  ;;  %v209_v4 = vld [vmem:[#allocation5 + $0x8] sm:$0xff]  ;;  %s216_s12 = scalar_lea.sflag [#allocation4], %s752_s16  ;;  %s484_s5 = scalar_lea.vmem %s765_s6, 256 }
  0x5d   : > { %v211_v5 = vadd.f32 %v209_v4, %v207_v2  ;;  %p485_p13 = scmp.ne.s32.totalorder %s765_s6, %s484_s5  ;;  %s576_s8 = smov [#allocation7]  }
  0x5e   : > { %213 = vst.msk [vmem:[%s202_s21] sm:$0xff] %vm212_vm0, %v210_v3  ;;  %s488_s15 = sshll.u32 %s576_s8, 4  ;;  %s489_s15 = int_to_ptr.vmem [resolvable:$false] %s488_s15 }
  0x5f   : > { %214 = vst.msk [vmem:[%s202_s21 + $0x8] sm:$0xff] %vm212_vm0, %v211_v5  ;;  %p486_p6 = pnand %p485_p13, %p693_p10  ;;  %s490_s30 = scalar_lea.vmem %s489_s15, 512 }
  0x60   : > { %p491_p12 = scmp.lt.s32.totalorder %s765_s6, %s489_s15  ;;  %p492_p11 = scmp.lt.s32.totalorder %s490_s30, %s484_s5 }
  0x61   : > { %p487_p8 = pneg %p486_p6 }
  0x62   : > { %p493_p0 = por %p492_p11, %p491_p12 }
  0x64   : > { %p494_p5 = pnand %p493_p0, %p487_p8 }
  0x66   : > { %497 = shalt.err (!%p494_p5)
}
  0x67   : > { %s498_s23 = scalar_lea.hbm %s770_s4, 256  ;;  %s502_s26 = scalar_lea.hbm %s821_s2, 512 }
  0x68   : > { %p499_p9 = scmp.ne.s32.totalorder %s770_s4, %s498_s23  ;;  %p503_p3 = scmp.lt.u32.totalorder %s770_s4, %s821_s2 }
  0x69   : > { %p504_p7 = scmp.lt.u32.totalorder %s502_s26, %s498_s23  ;;  %p506_p13 = scmp.lt.u32.totalorder %s498_s23, %s770_s4 }
  0x6a   : > { %p500_p1 = pnand %p499_p9, %p693_p10 }
  0x6b   : > { %p505_p4 = por %p504_p7, %p503_p3 }
  0x6c   : > { %p501_p2 = pneg %p500_p1 }
  0x6d   : > { %p507_p6 = por %p506_p13, %p505_p4 }
  0x6f   : > { %p508_p8 = pnand %p507_p6, %p501_p2 }
  0x71   : > { %511 = shalt.err (!%p508_p8)
}
  0x72   : > { %s577_s29 = smov 128   ;;  %s578_s21 = smov 8  }
  0x73   : > { %355 = dma.vmem_to_hbm [thread:$0]  (%p693_p10), %s765_s6, 256, %s770_s4, %s216_s12, %s577_s29, %s577_s29, %s578_s21  }
  0x74 PF: > { %s246_s7 = sand.u32 1, %s550_s9   ;;  %p839_p12 = scmp.ne.s32.totalorder %s829_s20, 0 }
  0x75   : > { %p840_p11 = scmp.ge.s32.totalorder %s570_s14, 2  ;;  %s247_s19 = scalar_lea.sflag [#allocation4], %s246_s7 }
  0x77   : > { %p366_p0 = pnand %p840_p11, %p839_p12 }
  0x79   : > { %545 = dma.done.wait (!%p366_p0), %s247_s19, 256  }
  0x7a   : > { %547 = vsyncadd (!%p366_p0), %s247_s19, 4294967040  ;;  %s19_s14 = sadd.s32 1, %s570_s14   ;;  %s841_s9 = smov %s554_s10 }
  0x7b   : > { %p16_p5 = scmp.ge.s32.totalorder %s19_s14, 4   ;;  %s842_s10 = smov %s558_s11 }
  0x7c   : > { %s843_s11 = smov %s702_s28  ;;  %s844_s12 = smov %s566_s13 }
  0x7d   : > { %s845_s13 = smov %s847_s25  ;;  %18 = sbr.rel (!%p16_p5) target bundleno = 7 (0x7), region = 78 }
  0x84   :  { %252 = vsyncpa [#allocation3], 1 }
  0x85   :  { %254 = vsyncpa [#allocation3 + $0x1], 1 }
  0x86   :  { %255 = vsyncpa [#allocation6], 1 }
  0x87   :  { %256 = vsyncpa [#allocation4], 1 }
  0x88   :  { %258 = vsyncpa [#allocation4 + $0x1], 1 }

</bundles_post_ra>
